<compile_context>
chip_gen: v7x
topology: tpu7x:2x2x1
jax: 0.10.0
libtpu: 0.0.40
codegen_flags: <defaults>
</compile_context>

<pallas_src>
import jax
import jax.numpy as jnp
from jax import lax
from jax.experimental import pallas as pl
from jax.experimental.pallas import tpu as pltpu

LAYER_SIZES = [2, 64, 64, 64, 1]
LANE = 128


def _chip_config():
    """Generation-aware tiling knobs (queried at trace time, not traced)."""
    try:
        kind = jax.devices()[0].device_kind.lower()
    except Exception:
        kind = ""
    is_v7 = ("v7" in kind) or ("tpu7" in kind) or ("7x" in kind)
    is_v5e = ("v5 lite" in kind) or ("v5e" in kind) or ("v5litepod" in kind)
    return {
        # v7x has 2 TensorCores per chip; v5e/v6e have 1 -> only split on v7x.
        "num_tc": 2 if is_v7 else 1,
        # Columns per grid step: v7x (64 MiB VMEM/TC) capped at 16384,
        # v5e/v6e (128 MiB) allowed 32768.
        "max_tile_cols": 16384 if is_v7 else 32768,
        # Inner chunk width: v5e has one vector-store slot per bundle -> 128;
        # v6e/v7x have two -> 256.
        "chunk": 128 if is_v5e else 256,
        # Generous scoped-VMEM budget (actual footprint with chunking is only
        # a few MiB of double-buffered I/O rows + resident weights).
        "vmem_limit_bytes": (32 << 20) if is_v7 else (64 << 20),
    }


def _round_up(x, m):
    return ((x + m - 1) // m) * m


def _choose_tile(n, cfg):
    """Columns per grid step: multiple of the inner chunk, as large as the
    per-generation cap, split across cores only on multi-TC chips (v7x)."""
    chunk = cfg["chunk"]
    cols = _round_up(max(n, 1), chunk)
    if cfg["num_tc"] > 1 and cols > chunk:
        cols_per_core = _round_up(pl.cdiv(cols, cfg["num_tc"]), chunk)
    else:
        cols_per_core = cols
    return min(cols_per_core, cfg["max_tile_cols"])


def _make_kernel(chunks_per_tile, chunk):
    unroll = min(4, chunks_per_tile)

    def kernel(x_ref, y_ref,
               w1x_ref, w1y_ref, b1_ref,
               w2_ref, b2_ref,
               w3_ref, b3_ref,
               w4_ref, b4_ref,
               o_ref):
        # Weights/biases are tiny (<= 16 KiB); load once per grid step and keep
        # them in vregs across the whole chunk loop.
        w1x = w1x_ref[...]   # (64, 1)
        w1y = w1y_ref[...]   # (64, 1)
        b1 = b1_ref[...]     # (64, 1)
        w2 = w2_ref[...]     # (64, 64)
        b2 = b2_ref[...]     # (64, 1)
        w3 = w3_ref[...]     # (64, 64)
        b3 = b3_ref[...]     # (64, 1)
        w4 = w4_ref[...]     # (64, 1)
        b4 = b4_ref[...]     # (1, 1)

        def chunk_body(c, carry):
            # Dynamic index on the leading (chunk) axis only; last two dims
            # stay (1, chunk) -> lane-dense loads/stores, no minor-dim ds.
            xc = x_ref[c]    # (1, chunk)
            yc = y_ref[c]    # (1, chunk)

            # Layer 1 (K=2): two broadcast multiply-adds on the VPU.
            h = jnp.tanh(w1x * xc + w1y * yc + b1)                # (64, chunk)

            # Layers 2/3: 64x64 MXU matmuls, f32 accumulation, feature-major.
            h = jnp.tanh(
                jnp.dot(w2, h, preferred_element_type=jnp.float32) + b2)
            h = jnp.tanh(
                jnp.dot(w3, h, preferred_element_type=jnp.float32) + b3)

            # Layer 4 (out=1): VPU multiply + XLU sublane reduction.
            out = jnp.sum(w4 * h, axis=0, keepdims=True) + b4     # (1, chunk)
            o_ref[c] = out.astype(o_ref.dtype)
            return carry

        lax.fori_loop(0, chunks_per_tile, chunk_body, 0, unroll=unroll)

    return kernel


def _resident(shape):
    # Whole-array block whose block index never changes: weights/biases stay
    # resident in VMEM across every grid step.
    return pl.BlockSpec(shape, lambda i: (0,) * len(shape))


@jax.jit
def mlp_forward(x, y, params):
    """x, y: (N, 1) float32. Returns (N, 1) float32."""
    n = x.shape[0]
    cfg = _chip_config()
    chunk = cfg["chunk"]
    tile_n = _choose_tile(n, cfg)
    grid = pl.cdiv(n, tile_n)
    n_pad = grid * tile_n
    chunks_per_tile = tile_n // chunk
    total_chunks = n_pad // chunk

    # Batch-to-lanes layout: (N, 1) column vectors -> (1, N) rows -> chunked
    # (total_chunks, 1, chunk).  All reshapes are contiguous; no (N, 2) concat
    # HBM round trip.
    x_row = x.reshape(1, n)
    y_row = y.reshape(1, n)
    if n_pad != n:
        pad = ((0, 0), (0, n_pad - n))
        x_row = jnp.pad(x_row, pad)
        y_row = jnp.pad(y_row, pad)
    x3 = x_row.reshape(total_chunks, 1, chunk)
    y3 = y_row.reshape(total_chunks, 1, chunk)

    (w1, b1), (w2, b2), (w3, b3), (w4, b4) = params
    # Weights kept in PyTorch (out, in) order so the kernel computes W @ h.
    w1x = w1[:, 0:1]            # (64, 1) first input column
    w1y = w1[:, 1:2]            # (64, 1) second input column
    w4c = w4.T                  # (64, 1) column for the VPU/XLU final layer

    io_spec = pl.BlockSpec((chunks_per_tile, 1, chunk), lambda i: (i, 0, 0))
    in_specs = [
        io_spec,                 # x tile
        io_spec,                 # y tile
        _resident(w1x.shape), _resident(w1y.shape), _resident(b1.shape),
        _resident(w2.shape), _resident(b2.shape),
        _resident(w3.shape), _resident(b3.shape),
        _resident(w4c.shape), _resident(b4.shape),
    ]
    out_spec = pl.BlockSpec((chunks_per_tile, 1, chunk), lambda i: (i, 0, 0))

    n_weight_elems = sum(int(w.size) + int(b.size) for (w, b) in params)
    cost = pl.CostEstimate(
        flops=2 * n_pad * (2 * 64 + 64 * 64 + 64 * 64 + 64 * 1),
        transcendentals=3 * 64 * n_pad,
        bytes_accessed=4 * (3 * n_pad + n_weight_elems),
    )

    out3 = pl.pallas_call(
        _make_kernel(chunks_per_tile, chunk),
        out_shape=jax.ShapeDtypeStruct((total_chunks, 1, chunk), jnp.float32),
        grid_spec=pltpu.PrefetchScalarGridSpec(
            num_scalar_prefetch=0,
            grid=(grid,),
            in_specs=in_specs,
            out_specs=out_spec,
        ),
        compiler_params=pltpu.CompilerParams(
            dimension_semantics=("parallel",),
            vmem_limit_bytes=cfg["vmem_limit_bytes"],
        ),
        cost_estimate=cost,
    )(x3, y3, w1x, w1y, b1, w2, b2, w3, b3, w4c, b4)

    return out3.reshape(1, n_pad)[:, :n].reshape(n, 1)


def init_params(key):
    """Kaiming-uniform init with tanh gain 5/3 and zero biases, matching the
    init policy of the PyTorch Model (exact torch RNG values not reproduced).
    Weights stored in PyTorch (out, in) order; biases as (out, 1) columns."""
    # TODO(synk): torch.manual_seed(42) RNG stream cannot be reproduced in JAX;
    # the init *scheme* matches, the random values do not.
    gain = 5.0 / 3.0
    params = []
    for i in range(len(LAYER_SIZES) - 1):
        fan_in, fan_out = LAYER_SIZES[i], LAYER_SIZES[i + 1]
        key, sub = jax.random.split(key)
        bound = gain * (3.0 / fan_in) ** 0.5
        w = jax.random.uniform(sub, (fan_out, fan_in), jnp.float32,
                               minval=-bound, maxval=bound)
        b = jnp.zeros((fan_out, 1), jnp.float32)
        params.append((w, b))
    return params


def reference_forward(x, y, params):
    h = jnp.concatenate([x, y], axis=1)            # (N, 2)
    for i, (w, b) in enumerate(params):
        h = h @ w.T + b.T                          # nn.Linear: h @ W.T + b
        if i < len(params) - 1:
            h = jnp.tanh(h)
    return h


if __name__ == "__main__":
    params = init_params(jax.random.PRNGKey(0))

    # Inputs consistent with the original script: column vectors of radii/angles.
    N = 256
    R = 40.0
    x = jnp.linspace(0.0, R, N, dtype=jnp.float32).reshape(-1, 1)
    ky = jax.random.fold_in(jax.random.PRNGKey(0), 1)
    y = jax.random.uniform(ky, (N, 1), jnp.float32, minval=0.0, maxval=R)

    out = jax.block_until_ready(mlp_forward(x, y, params))

    ref = reference_forward(x, y, params)
    assert out.shape == (N, 1), out.shape
    assert jnp.allclose(out, ref, atol=1e-4, rtol=1e-4), "mismatch vs reference"

    print("KERNEL_OK")
</pallas_src>

<mosaic_0001>
module attributes {stable_mosaic.version = 11 : i64} {
  func.func @kernel(%arg0: i32, %arg1: memref<1x1x256xf32, #tpu.memory_space<vmem>>, %arg2: memref<1x1x256xf32, #tpu.memory_space<vmem>>, %arg3: memref<64x1xf32, #tpu.memory_space<vmem>>, %arg4: memref<64x1xf32, #tpu.memory_space<vmem>>, %arg5: memref<64x1xf32, #tpu.memory_space<vmem>>, %arg6: memref<64x64xf32, #tpu.memory_space<vmem>>, %arg7: memref<64x1xf32, #tpu.memory_space<vmem>>, %arg8: memref<64x64xf32, #tpu.memory_space<vmem>>, %arg9: memref<64x1xf32, #tpu.memory_space<vmem>>, %arg10: memref<64x1xf32, #tpu.memory_space<vmem>>, %arg11: memref<1x1xf32, #tpu.memory_space<vmem>>, %arg12: memref<1x1x256xf32, #tpu.memory_space<vmem>>) attributes {dimension_semantics = [#tpu.dimension_semantics<parallel>], iteration_bounds = array<i64: 1>, scalar_prefetch = 0 : i64, scratch_operands = 0 : i64, tpu.core_type = #tpu.core_type<tc>, window_params = [{transform_indices = @transform_0, window_bounds = array<i64: 1, 1, 256>}, {transform_indices = @transform_1, window_bounds = array<i64: 1, 1, 256>}, {pipeline_mode = #tpu.pipeline_mode<synchronous>, transform_indices = @transform_2, window_bounds = array<i64: 64, 1>}, {pipeline_mode = #tpu.pipeline_mode<synchronous>, transform_indices = @transform_3, window_bounds = array<i64: 64, 1>}, {pipeline_mode = #tpu.pipeline_mode<synchronous>, transform_indices = @transform_4, window_bounds = array<i64: 64, 1>}, {pipeline_mode = #tpu.pipeline_mode<synchronous>, transform_indices = @transform_5, window_bounds = array<i64: 64, 64>}, {pipeline_mode = #tpu.pipeline_mode<synchronous>, transform_indices = @transform_6, window_bounds = array<i64: 64, 1>}, {pipeline_mode = #tpu.pipeline_mode<synchronous>, transform_indices = @transform_7, window_bounds = array<i64: 64, 64>}, {pipeline_mode = #tpu.pipeline_mode<synchronous>, transform_indices = @transform_8, window_bounds = array<i64: 64, 1>}, {pipeline_mode = #tpu.pipeline_mode<synchronous>, transform_indices = @transform_9, window_bounds = array<i64: 64, 1>}, {pipeline_mode = #tpu.pipeline_mode<synchronous>, transform_indices = @transform_10, window_bounds = array<i64: 1, 1>}, {transform_indices = @transform_11, window_bounds = array<i64: 1, 1, 256>}]} {
    %c0 = arith.constant 0 : index
    %c0_0 = arith.constant 0 : index
    %0 = vector.load %arg3[%c0, %c0_0] : memref<64x1xf32, #tpu.memory_space<vmem>>, vector<64x1xf32>
    %c0_1 = arith.constant 0 : index
    %c0_2 = arith.constant 0 : index
    %1 = vector.load %arg4[%c0_1, %c0_2] : memref<64x1xf32, #tpu.memory_space<vmem>>, vector<64x1xf32>
    %c0_3 = arith.constant 0 : index
    %c0_4 = arith.constant 0 : index
    %2 = vector.load %arg5[%c0_3, %c0_4] : memref<64x1xf32, #tpu.memory_space<vmem>>, vector<64x1xf32>
    %c0_5 = arith.constant 0 : index
    %c0_6 = arith.constant 0 : index
    %3 = vector.load %arg6[%c0_5, %c0_6] : memref<64x64xf32, #tpu.memory_space<vmem>>, vector<64x64xf32>
    %c0_7 = arith.constant 0 : index
    %c0_8 = arith.constant 0 : index
    %4 = vector.load %arg7[%c0_7, %c0_8] : memref<64x1xf32, #tpu.memory_space<vmem>>, vector<64x1xf32>
    %c0_9 = arith.constant 0 : index
    %c0_10 = arith.constant 0 : index
    %5 = vector.load %arg8[%c0_9, %c0_10] : memref<64x64xf32, #tpu.memory_space<vmem>>, vector<64x64xf32>
    %c0_11 = arith.constant 0 : index
    %c0_12 = arith.constant 0 : index
    %6 = vector.load %arg9[%c0_11, %c0_12] : memref<64x1xf32, #tpu.memory_space<vmem>>, vector<64x1xf32>
    %c0_13 = arith.constant 0 : index
    %c0_14 = arith.constant 0 : index
    %7 = vector.load %arg10[%c0_13, %c0_14] : memref<64x1xf32, #tpu.memory_space<vmem>>, vector<64x1xf32>
    %c0_15 = arith.constant 0 : index
    %c0_16 = arith.constant 0 : index
    %8 = vector.load %arg11[%c0_15, %c0_16] : memref<1x1xf32, #tpu.memory_space<vmem>>, vector<1x1xf32>
    %c0_i32 = arith.constant 0 : i32
    %9 = arith.index_cast %c0_i32 : i32 to index
    %c0_17 = arith.constant 0 : index
    %c0_18 = arith.constant 0 : index
    %10 = vector.load %arg1[%9, %c0_17, %c0_18] : memref<1x1x256xf32, #tpu.memory_space<vmem>>, vector<1x1x256xf32>
    %11 = vector.shape_cast %10 : vector<1x1x256xf32> to vector<1x256xf32>
    %12 = arith.index_cast %c0_i32 : i32 to index
    %c0_19 = arith.constant 0 : index
    %c0_20 = arith.constant 0 : index
    %13 = vector.load %arg2[%12, %c0_19, %c0_20] : memref<1x1x256xf32, #tpu.memory_space<vmem>>, vector<1x1x256xf32>
    %14 = vector.shape_cast %13 : vector<1x1x256xf32> to vector<1x256xf32>
    %15 = vector.broadcast %0 : vector<64x1xf32> to vector<64x256xf32>
    %16 = vector.broadcast %11 : vector<1x256xf32> to vector<64x256xf32>
    %17 = arith.mulf %15, %16 : vector<64x256xf32>
    %18 = vector.broadcast %1 : vector<64x1xf32> to vector<64x256xf32>
    %19 = vector.broadcast %14 : vector<1x256xf32> to vector<64x256xf32>
    %20 = arith.mulf %18, %19 : vector<64x256xf32>
    %21 = arith.addf %17, %20 : vector<64x256xf32>
    %22 = vector.broadcast %2 : vector<64x1xf32> to vector<64x256xf32>
    %23 = arith.addf %21, %22 : vector<64x256xf32>
    %24 = math.tanh %23 : vector<64x256xf32>
    %cst = arith.constant dense<0.000000e+00> : vector<64x256xf32>
    %25 = tpu.matmul %3, %24, %cst {dimension_numbers = #tpu.dot_dimension_numbers<[1], [0], [0], [1], [0, 0, 1, 1], [], []>} : vector<64x64xf32>, vector<64x256xf32>, vector<64x256xf32> -> vector<64x256xf32>
    %26 = vector.broadcast %4 : vector<64x1xf32> to vector<64x256xf32>
    %27 = arith.addf %25, %26 : vector<64x256xf32>
    %28 = math.tanh %27 : vector<64x256xf32>
    %cst_21 = arith.constant dense<0.000000e+00> : vector<64x256xf32>
    %29 = tpu.matmul %5, %28, %cst_21 {dimension_numbers = #tpu.dot_dimension_numbers<[1], [0], [0], [1], [0, 0, 1, 1], [], []>} : vector<64x64xf32>, vector<64x256xf32>, vector<64x256xf32> -> vector<64x256xf32>
    %30 = vector.broadcast %6 : vector<64x1xf32> to vector<64x256xf32>
    %31 = arith.addf %29, %30 : vector<64x256xf32>
    %32 = math.tanh %31 : vector<64x256xf32>
    %33 = vector.broadcast %7 : vector<64x1xf32> to vector<64x256xf32>
    %34 = arith.mulf %33, %32 : vector<64x256xf32>
    %cst_22 = arith.constant dense<0.000000e+00> : vector<256xf32>
    %35 = vector.multi_reduction <add>, %34, %cst_22 [0] : vector<64x256xf32> to vector<256xf32>
    %36 = vector.shape_cast %35 : vector<256xf32> to vector<1x256xf32>
    %37 = vector.broadcast %8 : vector<1x1xf32> to vector<1x256xf32>
    %38 = arith.addf %36, %37 : vector<1x256xf32>
    %39 = arith.index_cast %c0_i32 : i32 to index
    %c0_23 = arith.constant 0 : index
    %c0_24 = arith.constant 0 : index
    %40 = vector.load %arg12[%39, %c0_23, %c0_24] : memref<1x1x256xf32, #tpu.memory_space<vmem>>, vector<1x1x256xf32>
    %41 = vector.shape_cast %40 : vector<1x1x256xf32> to vector<1x256xf32>
    %42 = vector.shape_cast %38 : vector<1x256xf32> to vector<1x1x256xf32>
    tpu.vector_store %arg12[%39, %c0_23, %c0_24], %42 {strides = array<i32>} : memref<1x1x256xf32, #tpu.memory_space<vmem>>, vector<1x1x256xf32>,
    %c1_i32 = arith.constant 1 : i32
    return
  }
  func.func @transform_0(%arg0: i32) -> (i32, i32, i32) {
    %c0_i32 = arith.constant 0 : i32
    %c0_i32_0 = arith.constant 0 : i32
    %c0_i32_1 = arith.constant 0 : i32
    return %arg0, %c0_i32, %c0_i32_0 : i32, i32, i32
  }
  func.func @transform_1(%arg0: i32) -> (i32, i32, i32) {
    %c0_i32 = arith.constant 0 : i32
    %c0_i32_0 = arith.constant 0 : i32
    %c0_i32_1 = arith.constant 0 : i32
    return %arg0, %c0_i32, %c0_i32_0 : i32, i32, i32
  }
  func.func @transform_2(%arg0: i32) -> (i32, i32) {
    %c0_i32 = arith.constant 0 : i32
    %c0_i32_0 = arith.constant 0 : i32
    %c0_i32_1 = arith.constant 0 : i32
    return %c0_i32, %c0_i32_0 : i32, i32
  }
  func.func @transform_3(%arg0: i32) -> (i32, i32) {
    %c0_i32 = arith.constant 0 : i32
    %c0_i32_0 = arith.constant 0 : i32
    %c0_i32_1 = arith.constant 0 : i32
    return %c0_i32, %c0_i32_0 : i32, i32
  }
  func.func @transform_4(%arg0: i32) -> (i32, i32) {
    %c0_i32 = arith.constant 0 : i32
    %c0_i32_0 = arith.constant 0 : i32
    %c0_i32_1 = arith.constant 0 : i32
    return %c0_i32, %c0_i32_0 : i32, i32
  }
  func.func @transform_5(%arg0: i32) -> (i32, i32) {
    %c0_i32 = arith.constant 0 : i32
    %c0_i32_0 = arith.constant 0 : i32
    %c0_i32_1 = arith.constant 0 : i32
    return %c0_i32, %c0_i32_0 : i32, i32
  }
  func.func @transform_6(%arg0: i32) -> (i32, i32) {
    %c0_i32 = arith.constant 0 : i32
    %c0_i32_0 = arith.constant 0 : i32
    %c0_i32_1 = arith.constant 0 : i32
    return %c0_i32, %c0_i32_0 : i32, i32
  }
  func.func @transform_7(%arg0: i32) -> (i32, i32) {
    %c0_i32 = arith.constant 0 : i32
    %c0_i32_0 = arith.constant 0 : i32
    %c0_i32_1 = arith.constant 0 : i32
    return %c0_i32, %c0_i32_0 : i32, i32
  }
  func.func @transform_8(%arg0: i32) -> (i32, i32) {
    %c0_i32 = arith.constant 0 : i32
    %c0_i32_0 = arith.constant 0 : i32
    %c0_i32_1 = arith.constant 0 : i32
    return %c0_i32, %c0_i32_0 : i32, i32
  }
  func.func @transform_9(%arg0: i32) -> (i32, i32) {
    %c0_i32 = arith.constant 0 : i32
    %c0_i32_0 = arith.constant 0 : i32
    %c0_i32_1 = arith.constant 0 : i32
    return %c0_i32, %c0_i32_0 : i32, i32
  }
  func.func @transform_10(%arg0: i32) -> (i32, i32) {
    %c0_i32 = arith.constant 0 : i32
    %c0_i32_0 = arith.constant 0 : i32
    %c0_i32_1 = arith.constant 0 : i32
    return %c0_i32, %c0_i32_0 : i32, i32
  }
  func.func @transform_11(%arg0: i32) -> (i32, i32, i32) {
    %c0_i32 = arith.constant 0 : i32
    %c0_i32_0 = arith.constant 0 : i32
    %c0_i32_1 = arith.constant 0 : i32
    return %arg0, %c0_i32, %c0_i32_0 : i32, i32, i32
  }
}

</mosaic_0001>

<bundles_post_ra>
// kernel: mlp_forward.1
= control target key start
LH: loop header
LB: loop body
LE: loop exit
PB: predicated region body
PF: predicated region fallthrough
CT: control target
= control target key end

     0   :  { %s1722_s0 = inlined_call_operand.hbm [shape: f32[1,1,256], index: 0, kind: input, shape index: {}]   ;;  %s1723_s1 = inlined_call_operand.hbm [shape: f32[1,1,256], index: 1, kind: input, shape index: {}]   ;;  %s1724_s2 = inlined_call_operand.hbm [shape: f32[64,1], index: 2, kind: input, shape index: {}]   ;;  %s1725_s3 = inlined_call_operand.hbm [shape: f32[64,1], index: 3, kind: input, shape index: {}]   ;;  %s1726_s4 = inlined_call_operand.hbm [shape: f32[64,1], index: 4, kind: input, shape index: {}]   ;;  %s1727_s5 = inlined_call_operand.hbm [shape: f32[64,64], index: 5, kind: input, shape index: {}]   ;;  %s1728_s6 = inlined_call_operand.hbm [shape: f32[64,1], index: 6, kind: input, shape index: {}]   ;;  %s1729_s7 = inlined_call_operand.hbm [shape: f32[64,64], index: 7, kind: input, shape index: {}]   ;;  %s1730_s8 = inlined_call_operand.hbm [shape: f32[64,1], index: 8, kind: input, shape index: {}]   ;;  %s1731_s9 = inlined_call_operand.hbm [shape: f32[64,1], index: 9, kind: input, shape index: {}]   ;;  %s1732_s10 = inlined_call_operand.<no memory space> [shape: f32[1,1], index: 10, kind: input, shape index: {}]   ;;  %s1733_s11 = inlined_call_operand.hbm [shape: f32[1,1,256], index: 11, kind: output, shape index: {}]  }
   0x1   :  { %v16_v0 = vstv %s1732_s10 }
   0x2   :  { %17 = vst [vmem:[#allocation2] sm:$0x1] %v16_v0 }
   0x3   :  { %18 = vsyncpa [#allocation4], 0 }
   0x4   :  { %19 = vsyncpa [#allocation7], 0 }
   0x5   :  { %20 = vsyncpa [#allocation10], 0 }
   0x6   :  { %21 = vsyncpa [#allocation13], 0 }
   0x7   :  { %22 = vsyncpa [#allocation16], 0 }
   0x8   :  { %23 = vsyncpa [#allocation19], 0 }
   0x9   :  { %24 = vsyncpa [#allocation5], 0  ;;  %s1403_s19 = smov [#allocation6]   ;;  %s1147_s23 = scalar_lea.hbm %s1723_s1, 32 }
   0xa   :  { %s41_s20 = sshll.u32 %s1403_s19, 4  ;;  %p1148_p0 = scmp.ne.s32.totalorder %s1723_s1, %s1147_s23  ;;  %s42_s20 = int_to_ptr.vmem [resolvable:$true] %s41_s20 }
   0xb   :  { %p1151_p1 = scmp.lt.u32.totalorder %s1147_s23, %s1723_s1 }
   0xd   :  { %p1153_p2 = pnand %p1151_p1, %p1148_p0 }
   0xf   :  { %1156 = shalt.err (!%p1153_p2)
}
  0x10   :  { %s1157_s27 = scalar_lea.vmem %s42_s20, 32  ;;  %p1162_p4 = scmp.lt.s32.totalorder %s42_s20, %s42_s20 }
  0x11   :  { %p1158_p3 = scmp.ne.s32.totalorder %s42_s20, %s1157_s27  ;;  %p1163_p5 = scmp.lt.s32.totalorder %s1157_s27, %s1157_s27 }
  0x13   :  { %p1164_p6 = por %p1163_p5, %p1162_p4 }
  0x15   :  { %p1165_p7 = pnand %p1164_p6, %p1158_p3 }
  0x17   :  { %1168 = shalt.err (!%p1165_p7)
}
  0x18   :  { %44 = dma.hbm_to_vmem [thread:$0]  %s1723_s1, 32, %s42_s20, [#allocation7]  }
  0x19   :  { %s1404_s30 = smov [#allocation9]   ;;  %s1405_s13 = smov [#allocation12]  }
  0x1a   :  { %s62_s12 = sshll.u32 %s1404_s30, 4  ;;  %s86_s14 = sshll.u32 %s1405_s13, 4  ;;  %s63_s12 = int_to_ptr.vmem [resolvable:$true] %s62_s12  ;;  %s87_s14 = int_to_ptr.vmem [resolvable:$true] %s86_s14 }
  0x1b   :  { %s1169_s17 = scalar_lea.hbm %s1725_s3, 1024 }
  0x1c   :  { %p1170_p8 = scmp.ne.s32.totalorder %s1725_s3, %s1169_s17  ;;  %p1173_p9 = scmp.lt.u32.totalorder %s1169_s17, %s1725_s3 }
  0x1e   :  { %p1175_p10 = pnand %p1173_p9, %p1170_p8 }
  0x20   :  { %1178 = shalt.err (!%p1175_p10)
}
  0x21   :  { %s1179_s1 = scalar_lea.vmem %s63_s12, 1024  ;;  %p1184_p12 = scmp.lt.s32.totalorder %s63_s12, %s63_s12 }
  0x22   :  { %p1180_p11 = scmp.ne.s32.totalorder %s63_s12, %s1179_s1  ;;  %p1185_p13 = scmp.lt.s32.totalorder %s1179_s1, %s1179_s1 }
  0x24   :  { %p1186_p0 = por %p1185_p13, %p1184_p12 }
  0x26   :  { %p1187_p1 = pnand %p1186_p0, %p1180_p11 }
  0x28   :  { %1190 = shalt.err (!%p1187_p1)
}
  0x29   :  { %s1406_s20 = smov 128   ;;  %s1407_s23 = smov 8  }
  0x2a   :  { %68 = dma.hbm_to_vmem [thread:$0]  %s1725_s3, 1024, %s63_s12, [#allocation10], %s1406_s20, %s1406_s20, %s1407_s23  }
  0x2b   :  { %s1191_s27 = scalar_lea.hbm %s1727_s5, 1024 }
  0x2c   :  { %p1192_p2 = scmp.ne.s32.totalorder %s1727_s5, %s1191_s27  ;;  %p1195_p3 = scmp.lt.u32.totalorder %s1191_s27, %s1727_s5 }
  0x2e   :  { %p1197_p4 = pnand %p1195_p3, %p1192_p2 }
  0x30   :  { %1200 = shalt.err (!%p1197_p4)
}
  0x31   :  { %s1201_s15 = scalar_lea.vmem %s87_s14, 1024  ;;  %p1206_p6 = scmp.lt.s32.totalorder %s87_s14, %s87_s14 }
  0x32   :  { %p1202_p5 = scmp.ne.s32.totalorder %s87_s14, %s1201_s15  ;;  %p1207_p7 = scmp.lt.s32.totalorder %s1201_s15, %s1201_s15 }
  0x34   :  { %p1208_p8 = por %p1207_p7, %p1206_p6 }
  0x36   :  { %p1209_p9 = pnand %p1208_p8, %p1202_p5 }
  0x38   :  { %1212 = shalt.err (!%p1209_p9)
}
  0x39   :  { %92 = dma.hbm_to_vmem [thread:$0]  %s1727_s5, 1024, %s87_s14, [#allocation13], %s1406_s20, %s1406_s20, %s1407_s23  }
  0x3a   :  { %s1408_s16 = smov [#allocation15]   ;;  %s1409_s18 = smov [#allocation3]  }
  0x3b   :  { %s110_s17 = sshll.u32 %s1408_s16, 4  ;;  %s31_s19 = sshll.u32 %s1409_s18, 4  ;;  %s111_s17 = int_to_ptr.vmem [resolvable:$true] %s110_s17  ;;  %s32_s19 = int_to_ptr.vmem [resolvable:$true] %s31_s19 }
  0x3c   :  { %s1213_s1 = scalar_lea.hbm %s1729_s7, 1024 }
  0x3d   :  { %p1214_p10 = scmp.ne.s32.totalorder %s1729_s7, %s1213_s1  ;;  %p1217_p11 = scmp.lt.u32.totalorder %s1213_s1, %s1729_s7 }
  0x3f   :  { %p1219_p12 = pnand %p1217_p11, %p1214_p10 }
  0x41   :  { %1222 = shalt.err (!%p1219_p12)
}
  0x42   :  { %s1223_s5 = scalar_lea.vmem %s111_s17, 1024  ;;  %p1228_p0 = scmp.lt.s32.totalorder %s111_s17, %s111_s17 }
  0x43   :  { %p1224_p13 = scmp.ne.s32.totalorder %s111_s17, %s1223_s5  ;;  %p1229_p1 = scmp.lt.s32.totalorder %s1223_s5, %s1223_s5 }
  0x45   :  { %p1230_p2 = por %p1229_p1, %p1228_p0 }
  0x47   :  { %p1231_p3 = pnand %p1230_p2, %p1224_p13 }
  0x49   :  { %1234 = shalt.err (!%p1231_p3)
}
  0x4a   :  { %116 = dma.hbm_to_vmem [thread:$0]  %s1729_s7, 1024, %s111_s17, [#allocation16], %s1406_s20, %s1406_s20, %s1407_s23  }
  0x4b   :  { %s1235_s30 = scalar_lea.hbm %s1722_s0, 32 }
  0x4c   :  { %p1236_p4 = scmp.ne.s32.totalorder %s1722_s0, %s1235_s30  ;;  %p1239_p5 = scmp.lt.u32.totalorder %s1235_s30, %s1722_s0 }
  0x4e   :  { %p1241_p6 = pnand %p1239_p5, %p1236_p4 }
  0x50   :  { %1244 = shalt.err (!%p1241_p6)
}
  0x51   :  { %s1245_s16 = scalar_lea.vmem %s32_s19, 32  ;;  %p1250_p8 = scmp.lt.s32.totalorder %s32_s19, %s32_s19 }
  0x52   :  { %p1246_p7 = scmp.ne.s32.totalorder %s32_s19, %s1245_s16  ;;  %p1251_p9 = scmp.lt.s32.totalorder %s1245_s16, %s1245_s16 }
  0x54   :  { %p1252_p10 = por %p1251_p9, %p1250_p8 }
  0x56   :  { %p1253_p11 = pnand %p1252_p10, %p1246_p7 }
  0x58   :  { %1256 = shalt.err (!%p1253_p11)
}
  0x59   :  { %34 = dma.hbm_to_vmem [thread:$0]  %s1722_s0, 32, %s32_s19, [#allocation4]  }
  0x5a   :  { %s1410_s18 = smov [#allocation8]   ;;  %s1411_s22 = smov [#allocation11]  }
  0x5b   :  { %s50_s21 = sshll.u32 %s1410_s18, 4  ;;  %s74_s1 = sshll.u32 %s1411_s22, 4  ;;  %s51_s21 = int_to_ptr.vmem [resolvable:$true] %s50_s21  ;;  %s75_s1 = int_to_ptr.vmem [resolvable:$true] %s74_s1 }
  0x5c   :  { %s1257_s10 = scalar_lea.hbm %s1724_s2, 1024 }
  0x5d   :  { %p1258_p12 = scmp.ne.s32.totalorder %s1724_s2, %s1257_s10  ;;  %p1261_p13 = scmp.lt.u32.totalorder %s1257_s10, %s1724_s2 }
  0x5f   :  { %p1263_p0 = pnand %p1261_p13, %p1258_p12 }
  0x61   :  { %1266 = shalt.err (!%p1263_p0)
}
  0x62   :  { %s1267_s0 = scalar_lea.vmem %s51_s21, 1024  ;;  %p1272_p2 = scmp.lt.s32.totalorder %s51_s21, %s51_s21 }
  0x63   :  { %p1268_p1 = scmp.ne.s32.totalorder %s51_s21, %s1267_s0  ;;  %p1273_p3 = scmp.lt.s32.totalorder %s1267_s0, %s1267_s0 }
  0x65   :  { %p1274_p4 = por %p1273_p3, %p1272_p2 }
  0x67   :  { %p1275_p5 = pnand %p1274_p4, %p1268_p1 }
  0x69   :  { %1278 = shalt.err (!%p1275_p5)
}
  0x6a   :  { %56 = dma.hbm_to_vmem [thread:$0]  %s1724_s2, 1024, %s51_s21, [#allocation7], %s1406_s20, %s1406_s20, %s1407_s23  }
  0x6b   :  { %s1279_s13 = scalar_lea.hbm %s1726_s4, 1024 }
  0x6c   :  { %p1280_p6 = scmp.ne.s32.totalorder %s1726_s4, %s1279_s13  ;;  %p1283_p7 = scmp.lt.u32.totalorder %s1279_s13, %s1726_s4 }
  0x6e   :  { %p1285_p8 = pnand %p1283_p7, %p1280_p6 }
  0x70   :  { %1288 = shalt.err (!%p1285_p8)
}
  0x71   :  { %s1289_s7 = scalar_lea.vmem %s75_s1, 1024  ;;  %p1294_p10 = scmp.lt.s32.totalorder %s75_s1, %s75_s1 }
  0x72   :  { %p1290_p9 = scmp.ne.s32.totalorder %s75_s1, %s1289_s7  ;;  %p1295_p11 = scmp.lt.s32.totalorder %s1289_s7, %s1289_s7 }
  0x74   :  { %p1296_p12 = por %p1295_p11, %p1294_p10 }
  0x76   :  { %p1297_p13 = pnand %p1296_p12, %p1290_p9 }
  0x78   :  { %1300 = shalt.err (!%p1297_p13)
}
  0x79   :  { %80 = dma.hbm_to_vmem [thread:$0]  %s1726_s4, 1024, %s75_s1, [#allocation10], %s1406_s20, %s1406_s20, %s1407_s23  }
  0x7a   :  { %s1412_s18 = smov [#allocation14]   ;;  %s1413_s22 = smov [#allocation17]  }
  0x7b   :  { %s98_s21 = sshll.u32 %s1412_s18, 4  ;;  %s122_s24 = sshll.u32 %s1413_s22, 4  ;;  %s99_s21 = int_to_ptr.vmem [resolvable:$true] %s98_s21  ;;  %s123_s24 = int_to_ptr.vmem [resolvable:$true] %s122_s24 }
  0x7c   :  { %s1301_s26 = scalar_lea.hbm %s1728_s6, 1024 }
  0x7d   :  { %p1302_p0 = scmp.ne.s32.totalorder %s1728_s6, %s1301_s26  ;;  %p1305_p1 = scmp.lt.u32.totalorder %s1301_s26, %s1728_s6 }
  0x7f   :  { %p1307_p2 = pnand %p1305_p1, %p1302_p0 }
  0x81   :  { %1310 = shalt.err (!%p1307_p2)
}
  0x82   :  { %s1311_s4 = scalar_lea.vmem %s99_s21, 1024  ;;  %p1316_p4 = scmp.lt.s32.totalorder %s99_s21, %s99_s21 }
  0x83   :  { %p1312_p3 = scmp.ne.s32.totalorder %s99_s21, %s1311_s4  ;;  %p1317_p5 = scmp.lt.s32.totalorder %s1311_s4, %s1311_s4 }
  0x85   :  { %p1318_p6 = por %p1317_p5, %p1316_p4 }
  0x87   :  { %p1319_p7 = pnand %p1318_p6, %p1312_p3 }
  0x89   :  { %1322 = shalt.err (!%p1319_p7)
}
  0x8a   :  { %104 = dma.hbm_to_vmem [thread:$0]  %s1728_s6, 1024, %s99_s21, [#allocation13], %s1406_s20, %s1406_s20, %s1407_s23  }
  0x8b   :  { %s1323_s30 = scalar_lea.hbm %s1730_s8, 1024 }
  0x8c   :  { %p1324_p8 = scmp.ne.s32.totalorder %s1730_s8, %s1323_s30  ;;  %p1327_p9 = scmp.lt.u32.totalorder %s1323_s30, %s1730_s8 }
  0x8e   :  { %p1329_p10 = pnand %p1327_p9, %p1324_p8 }
  0x90   :  { %1332 = shalt.err (!%p1329_p10)
}
  0x91   :  { %s1333_s16 = scalar_lea.vmem %s123_s24, 1024  ;;  %p1338_p12 = scmp.lt.s32.totalorder %s123_s24, %s123_s24 }
  0x92   :  { %p1334_p11 = scmp.ne.s32.totalorder %s123_s24, %s1333_s16  ;;  %p1339_p13 = scmp.lt.s32.totalorder %s1333_s16, %s1333_s16 }
  0x94   :  { %p1340_p0 = por %p1339_p13, %p1338_p12 }
  0x96   :  { %p1341_p1 = pnand %p1340_p0, %p1334_p11 }
  0x98   :  { %1344 = shalt.err (!%p1341_p1)
}
  0x99   :  { %128 = dma.hbm_to_vmem [thread:$0]  %s1730_s8, 1024, %s123_s24, [#allocation16], %s1406_s20, %s1406_s20, %s1407_s23  }
  0x9a   :  { %s1414_s2 = smov [#allocation18]   ;;  %s1345_s22 = scalar_lea.hbm %s1731_s9, 1024 }
  0x9b   :  { %s134_s17 = sshll.u32 %s1414_s2, 4  ;;  %p1346_p2 = scmp.ne.s32.totalorder %s1731_s9, %s1345_s22  ;;  %s135_s17 = int_to_ptr.vmem [resolvable:$true] %s134_s17 }
  0x9c   :  { %p1349_p3 = scmp.lt.u32.totalorder %s1345_s22, %s1731_s9 }
  0x9e   :  { %p1351_p4 = pnand %p1349_p3, %p1346_p2 }
  0xa0   :  { %1354 = shalt.err (!%p1351_p4)
}
  0xa1   :  { %s1355_s14 = scalar_lea.vmem %s135_s17, 1024  ;;  %p1360_p6 = scmp.lt.s32.totalorder %s135_s17, %s135_s17 }
  0xa2   :  { %p1356_p5 = scmp.ne.s32.totalorder %s135_s17, %s1355_s14  ;;  %p1361_p7 = scmp.lt.s32.totalorder %s1355_s14, %s1355_s14 }
  0xa4   :  { %p1362_p8 = por %p1361_p7, %p1360_p6 }
  0xa6   :  { %p1363_p9 = pnand %p1362_p8, %p1356_p5 }
  0xa8   :  { %1366 = shalt.err (!%p1363_p9)
}
  0xa9   :  { %140 = dma.hbm_to_vmem [thread:$0]  %s1731_s9, 1024, %s135_s17, [#allocation19], %s1406_s20, %s1406_s20, %s1407_s23  }
  0xaa   :  { %1389 = dma.done.wait [#allocation4], 32  }
  0xab   :  { %1390 = vsyncadd [#allocation4], 4294967264 }
  0xac   :  { %1391 = dma.done.wait [#allocation7], 1056  }
  0xad   :  { %1392 = vsyncadd [#allocation7], 4294966240 }
  0xae   :  { %1393 = dma.done.wait [#allocation10], 2048  }
  0xaf   :  { %1394 = vsyncadd [#allocation10], 4294965248 }
  0xb0   :  { %1395 = dma.done.wait [#allocation13], 2048  }
  0xb1   :  { %1396 = vsyncadd [#allocation13], 4294965248 }
  0xb2   :  { %1397 = dma.done.wait [#allocation16], 2048  }
  0xb3   :  { %1398 = vsyncadd [#allocation16], 4294965248 }
  0xb4   :  { %1399 = dma.done.wait [#allocation19], 1024  }
  0xb5   :  { %1400 = vsyncadd [#allocation19], 4294966272  ;;  %v1415_v1 = vmov 0   ;;  %v181_v2 = vld [vmem:[#allocation9] sm:$0xff]  ;;  %v182_v4 = vld [vmem:[#allocation9 + $0x8] sm:$0xff]  ;;  %v1416_v38 = vmov 0.0   ;;  %v281_v52 = vlaneseq }
  0xb6   :  { %1050 = vset.pattern.permute.xlu1 %v1415_v1  ;;  %1049 = vset.pattern.permute.xlu0 %v1415_v1  ;;  %v173_v3 = vld [vmem:[#allocation8] sm:$0xff]  ;;  %v174_v5 = vld [vmem:[#allocation8 + $0x8] sm:$0xff]  ;;  %v176_v6 = vld [vmem:[#allocation8 + $0x18] sm:$0xff]  ;;  %vm502_vm0 = vcmask 523264   ;;  %s1418_s9 = smov [#allocation20]  }
  0xb7   :  { %309 = vperm.xlu1 %1050, %v181_v2   ;;  %242 = vperm.xlu0 %1049, %v173_v3   ;;  %v175_v7 = vld [vmem:[#allocation8 + $0x10] sm:$0xff]  ;;  %v184_v8 = vld [vmem:[#allocation9 + $0x18] sm:$0xff]  ;;  %v190_v10 = vld [vmem:[#allocation11 + $0x8] sm:$0xff]  ;;  %v1629_v53 = vshrl.u32 %v281_v52, 7  ;;  %s971_s20 = sshll.u32 %s1418_s9, 4  ;;  %vm962_vm1 = vcmp.lt.s32.totalorder %v281_v52, 256  ;;  %s972_s20 = int_to_ptr.vmem [resolvable:$true] %s971_s20 }
  0xb8   :  { %v183_v9 = vld [vmem:[#allocation9 + $0x10] sm:$0xff]  ;;  %v189_v11 = vld [vmem:[#allocation11] sm:$0xff]  ;;  %v178_v12 = vld [vmem:[#allocation8 + $0x28] sm:$0xff]  ;;  %591 = vmatprep.mubr.f32.mxu0 %v1416_v38  ;;  %784 = vmatprep.mubr.f32.mxu1 %v1416_v38  ;;  %s1367_s23 = scalar_lea.vmem %s972_s20, 32  ;;  %p1372_p11 = scmp.lt.s32.totalorder %s972_s20, %s972_s20 }
  0xb9   :  { %v177_v13 = vld [vmem:[#allocation8 + $0x20] sm:$0xff]  ;;  %v186_v14 = vld [vmem:[#allocation9 + $0x28] sm:$0xff]  ;;  %v192_v16 = vld [vmem:[#allocation11 + $0x18] sm:$0xff]  ;;  %v1632_v56 = vsub.s32 0, %v1629_v53  ;;  %v287_v59 = vsub.s32 1, %v1629_v53  ;;  %p1368_p10 = scmp.ne.s32.totalorder %s972_s20, %s1367_s23  ;;  %p1373_p12 = scmp.lt.s32.totalorder %s1367_s23, %s1367_s23 }
  0xba   :  { %v185_v15 = vld [vmem:[#allocation9 + $0x20] sm:$0xff]  ;;  %v191_v17 = vld [vmem:[#allocation11 + $0x10] sm:$0xff]  ;;  %v180_v18 = vld [vmem:[#allocation8 + $0x38] sm:$0xff] }
  0xbb   :  { %314 = vperm.xlu1 %1050, %v182_v4   ;;  %247 = vperm.xlu0 %1049, %v174_v5   ;;  %v179_v19 = vld [vmem:[#allocation8 + $0x30] sm:$0xff]  ;;  %v188_v20 = vld [vmem:[#allocation9 + $0x38] sm:$0xff]  ;;  %v194_v22 = vld [vmem:[#allocation11 + $0x28] sm:$0xff]  ;;  %p1374_p13 = por %p1373_p12, %p1372_p11 }
  0xbc   :  { %v187_v21 = vld [vmem:[#allocation9 + $0x30] sm:$0xff]  ;;  %v193_v23 = vld [vmem:[#allocation11 + $0x20] sm:$0xff]  ;;  %v196_v24 = vld [vmem:[#allocation11 + $0x38] sm:$0xff] }
  0xbd   :  { %v195_v25 = vld [vmem:[#allocation11 + $0x30] sm:$0xff]  ;;  %v206_v26 = vld [vmem:[#allocation14 + $0x8] sm:$0xff]  ;;  %v205_v27 = vld [vmem:[#allocation14] sm:$0xff]  ;;  %p1375_p0 = pnand %p1374_p13, %p1368_p10 }
  0xbe   :  { %v208_v28 = vld [vmem:[#allocation14 + $0x18] sm:$0xff]  ;;  %v207_v29 = vld [vmem:[#allocation14 + $0x10] sm:$0xff]  ;;  %v210_v30 = vld [vmem:[#allocation14 + $0x28] sm:$0xff] }
  0xbf   :  { %257 = vperm.xlu1 %1050, %v176_v6   ;;  %252 = vperm.xlu0 %1049, %v175_v7   ;;  %v209_v31 = vld [vmem:[#allocation14 + $0x20] sm:$0xff]  ;;  %v212_v32 = vld [vmem:[#allocation14 + $0x38] sm:$0xff]  ;;  %v211_v33 = vld [vmem:[#allocation14 + $0x30] sm:$0xff] }
  0xc0   :  { %v222_v34 = vld [vmem:[#allocation17 + $0x8] sm:$0xff]  ;;  %v221_v35 = vld [vmem:[#allocation17] sm:$0xff]  ;;  %v224_v36 = vld [vmem:[#allocation17 + $0x18] sm:$0xff] }
  0xc1   :  { %v223_v37 = vld [vmem:[#allocation17 + $0x10] sm:$0xff]  ;;  %v226_v39 = vld [vmem:[#allocation17 + $0x28] sm:$0xff]  ;;  %v225_v40 = vld [vmem:[#allocation17 + $0x20] sm:$0xff] }
  0xc2   :  { %v228_v41 = vld [vmem:[#allocation17 + $0x38] sm:$0xff]  ;;  %v227_v42 = vld [vmem:[#allocation17 + $0x30] sm:$0xff]  ;;  %v230_v43 = vld [vmem:[#allocation18 + $0x8] sm:$0xff] }
  0xc3   :  { %324 = vperm.xlu1 %1050, %v184_v8   ;;  %319 = vperm.xlu0 %1049, %v183_v9   ;;  %v229_v44 = vld [vmem:[#allocation18] sm:$0xff]  ;;  %v232_v45 = vld [vmem:[#allocation18 + $0x18] sm:$0xff]  ;;  %v231_v46 = vld [vmem:[#allocation18 + $0x10] sm:$0xff] }
  0xc4   :  { %v234_v47 = vld [vmem:[#allocation18 + $0x28] sm:$0xff]  ;;  %v233_v48 = vld [vmem:[#allocation18 + $0x20] sm:$0xff]  ;;  %v236_v49 = vld [vmem:[#allocation18 + $0x38] sm:$0xff] }
  0xc5   :  { %v235_v50 = vld [vmem:[#allocation18 + $0x30] sm:$0xff]  ;;  %v237_v51 = vld [vmem:[#allocation2] sm:$0x1]  ;;  %v239_v57 = vld [vmem:[#allocation6] sm:$0x3] }
  0xc6   :  { %v238_v58 = vld [vmem:[#allocation3] sm:$0x3]  ;;  %v1636_v62 = vrot.slane %v239_v57, %v1632_v56  ;;  %v1641_v0 = vrot.slane %v239_v57, %v287_v59 }
  0xc7   :  { %397 = vperm.xlu1 %1050, %v190_v10   ;;  %392 = vperm.xlu0 %1049, %v189_v11   ;;  %v1639_v63 = vrot.slane %v238_v58, %v1632_v56  ;;  %v1643_v1 = vrot.slane %v238_v58, %v287_v59 }
  0xcb   :  { %267 = vperm.xlu1 %1050, %v178_v12   ;;  %262 = vperm.xlu0 %1049, %v177_v13  }
  0xcf   :  { %334 = vperm.xlu1 %1050, %v186_v14   ;;  %329 = vperm.xlu0 %1049, %v185_v15  }
  0xd3   :  { %407 = vperm.xlu1 %1050, %v192_v16   ;;  %402 = vperm.xlu0 %1049, %v191_v17  }
  0xd7   :  { %277 = vperm.xlu1 %1050, %v180_v18   ;;  %272 = vperm.xlu0 %1049, %v179_v19  }
  0xdb   :  { %344 = vperm.xlu1 %1050, %v188_v20   ;;  %339 = vperm.xlu0 %1049, %v187_v21  }
  0xdf   :  { %417 = vperm.xlu1 %1050, %v194_v22   ;;  %412 = vperm.xlu0 %1049, %v193_v23  }
  0xe3   :  { %427 = vperm.xlu1 %1050, %v196_v24   ;;  %422 = vperm.xlu0 %1049, %v195_v25  }
  0xe7   :  { %469 = vperm.xlu1 %1050, %v206_v26   ;;  %464 = vperm.xlu0 %1049, %v205_v27  }
  0xeb   :  { %479 = vperm.xlu1 %1050, %v208_v28   ;;  %474 = vperm.xlu0 %1049, %v207_v29  }
  0xef   :  { %489 = vperm.xlu1 %1050, %v210_v30   ;;  %484 = vperm.xlu0 %1049, %v209_v31  }
  0xf3   :  { %499 = vperm.xlu1 %1050, %v212_v32   ;;  %494 = vperm.xlu0 %1049, %v211_v33  }
  0xf7   :  { %663 = vperm.xlu1 %1050, %v222_v34   ;;  %658 = vperm.xlu0 %1049, %v221_v35  }
  0xfb   :  { %673 = vperm.xlu1 %1050, %v224_v36   ;;  %668 = vperm.xlu0 %1049, %v223_v37  }
  0xff   :  { %683 = vperm.xlu1 %1050, %v226_v39   ;;  %678 = vperm.xlu0 %1049, %v225_v40  }
 0x103   :  { %693 = vperm.xlu1 %1050, %v228_v41   ;;  %688 = vperm.xlu0 %1049, %v227_v42  }
 0x107   :  { %856 = vperm.xlu1 %1050, %v230_v43   ;;  %851 = vperm.xlu0 %1049, %v229_v44  }
 0x10b   :  { %866 = vperm.xlu1 %1050, %v232_v45   ;;  %861 = vperm.xlu0 %1049, %v231_v46  }
 0x10f   :  { %876 = vperm.xlu1 %1050, %v234_v47   ;;  %871 = vperm.xlu0 %1049, %v233_v48  }
 0x113   :  { %886 = vperm.xlu1 %1050, %v236_v49   ;;  %881 = vperm.xlu0 %1049, %v235_v50  }
 0x117   :  { %933 = vperm.xlu0 %1049, %v237_v51  }
 0x136   :  { %v310_v54 = vpop.permute.xlu1 %309  ;;  %v243_v55 = vpop.permute.xlu0 %242 }
 0x137   :  { %v358_v4 = vmul.f32 %v1636_v62, %v310_v54  ;;  %v291_v5 = vmul.f32 %v1639_v63, %v243_v55  ;;  %v359_v10 = vmul.f32 %v1641_v0, %v310_v54  ;;  %v292_v11 = vmul.f32 %v1643_v1, %v243_v55 }
 0x139   :  { %v374_v16 = vadd.f32 %v358_v4, %v291_v5  ;;  %v375_v18 = vadd.f32 %v359_v10, %v292_v11 }
 0x13a   :  { %v315_v60 = vpop.permute.xlu1 %314  ;;  %v248_v61 = vpop.permute.xlu0 %247 }
 0x13b   :  { %v360_v6 = vmul.f32 %v1636_v62, %v315_v60  ;;  %v361_v7 = vmul.f32 %v1641_v0, %v315_v60  ;;  %v293_v8 = vmul.f32 %v1639_v63, %v248_v61  ;;  %v294_v9 = vmul.f32 %v1643_v1, %v248_v61 }
 0x13d   :  { %v376_v14 = vadd.f32 %v360_v6, %v293_v8  ;;  %v377_v15 = vadd.f32 %v361_v7, %v294_v9 }
 0x13e   :  { %v258_v2 = vpop.permute.xlu1 %257  ;;  %v253_v3 = vpop.permute.xlu0 %252 }
 0x13f   :  { %v297_v32 = vmul.f32 %v1639_v63, %v258_v2  ;;  %v298_v33 = vmul.f32 %v1643_v1, %v258_v2  ;;  %v295_v34 = vmul.f32 %v1639_v63, %v253_v3  ;;  %v296_v35 = vmul.f32 %v1643_v1, %v253_v3 }
 0x142   :  { %v325_v12 = vpop.permute.xlu1 %324  ;;  %v320_v13 = vpop.permute.xlu0 %319 }
 0x143   :  { %v364_v26 = vmul.f32 %v1636_v62, %v325_v12  ;;  %v365_v27 = vmul.f32 %v1641_v0, %v325_v12  ;;  %v362_v28 = vmul.f32 %v1636_v62, %v320_v13  ;;  %v363_v29 = vmul.f32 %v1641_v0, %v320_v13 }
 0x145   :  { %v380_v36 = vadd.f32 %v364_v26, %v297_v32  ;;  %v381_v37 = vadd.f32 %v365_v27, %v298_v33  ;;  %v378_v39 = vadd.f32 %v362_v28, %v295_v34  ;;  %v379_v41 = vadd.f32 %v363_v29, %v296_v35 }
 0x146   :  { %v398_v17 = vpop.permute.xlu1 %397  ;;  %v393_v19 = vpop.permute.xlu0 %392 }
 0x147   :  { %v432_v20 = vadd.f32 %v398_v17, %v376_v14  ;;  %v433_v21 = vadd.f32 %v398_v17, %v377_v15  ;;  %v430_v22 = vadd.f32 %v393_v19, %v374_v16  ;;  %v431_v23 = vadd.f32 %v393_v19, %v375_v18 }
 0x149   :  { %1051 = vtanh.f32 %v432_v20 }
 0x14a   :  { %1053 = vtanh.f32 %v433_v21  ;;  %v268_v24 = vpop.permute.xlu1 %267  ;;  %v263_v25 = vpop.permute.xlu0 %262 }
 0x14b   :  { %1055 = vtanh.f32 %v430_v22  ;;  %v301_v61 = vmul.f32 %v1639_v63, %v268_v24  ;;  %v302_v5 = vmul.f32 %v1643_v1, %v268_v24  ;;  %v299_v6 = vmul.f32 %v1639_v63, %v263_v25 }
 0x14c   :  { %1057 = vtanh.f32 %v431_v23  ;;  %v300_v7 = vmul.f32 %v1643_v1, %v263_v25 }
 0x14e   :  { %v335_v30 = vpop.permute.xlu1 %334  ;;  %v330_v31 = vpop.permute.xlu0 %329 }
 0x14f   :  { %v368_v58 = vmul.f32 %v1636_v62, %v335_v30  ;;  %v369_v59 = vmul.f32 %v1641_v0, %v335_v30  ;;  %v366_v60 = vmul.f32 %v1636_v62, %v330_v31  ;;  %v367_v2 = vmul.f32 %v1641_v0, %v330_v31 }
 0x151   :  { %v384_v8 = vadd.f32 %v368_v58, %v301_v61  ;;  %v385_v11 = vadd.f32 %v369_v59, %v302_v5  ;;  %v382_v12 = vadd.f32 %v366_v60, %v299_v6  ;;  %v383_v17 = vadd.f32 %v367_v2, %v300_v7  ;;  %v201_v58 = vld [vmem:[#allocation12 + $0x20] sm:$0xff]  ;;  %v202_v59 = vld [vmem:[#allocation12 + $0x28] sm:$0xff]  ;;  %v203_v60 = vld [vmem:[#allocation12 + $0x30] sm:$0xff] }
 0x152   :  { %v408_v40 = vpop.permute.xlu1 %407  ;;  %v403_v42 = vpop.permute.xlu0 %402  ;;  %v204_v61 = vld [vmem:[#allocation12 + $0x38] sm:$0xff] }
 0x153   :  { %v1052_v43 = vpop.eup %1051  ;;  %v436_v44 = vadd.f32 %v408_v40, %v380_v36  ;;  %v437_v45 = vadd.f32 %v408_v40, %v381_v37  ;;  %v434_v46 = vadd.f32 %v403_v42, %v378_v39  ;;  %v435_v48 = vadd.f32 %v403_v42, %v379_v41 }
 0x154   :  { %v1054_v47 = vpop.eup %1053 }
 0x155   :  { %v1056_v49 = vpop.eup %1055  ;;  %1059 = vtanh.f32 %v436_v44 }
 0x156   :  { %v1058_v50 = vpop.eup %1057  ;;  %1061 = vtanh.f32 %v437_v45  ;;  %v278_v51 = vpop.permute.xlu1 %277  ;;  %v1003_v55 = vpack.c.bf16 %v1052_v43, %v1056_v49 }
 0x157   :  { %v273_v54 = vpop.permute.xlu0 %272  ;;  %1063 = vtanh.f32 %v434_v46  ;;  %v1001_v57 = vpack.c.bf16 %v1054_v47, %v1058_v50  ;;  %v305_v13 = vmul.f32 %v1639_v63, %v278_v51  ;;  %v306_v20 = vmul.f32 %v1643_v1, %v278_v51  ;;  %v197_v51 = vld [vmem:[#allocation12] sm:$0xff] }
 0x158   :  { %1065 = vtanh.f32 %v435_v48  ;;  %v303_v25 = vmul.f32 %v1639_v63, %v273_v54  ;;  %v304_v26 = vmul.f32 %v1643_v1, %v273_v54  ;;  %v198_v54 = vld [vmem:[#allocation12 + $0x8] sm:$0xff] }
 0x159   :  { %1002 = vmatprep.subr.bf16.mxu0 %v1001_v57  ;;  %v200_v57 = vld [vmem:[#allocation12 + $0x18] sm:$0xff] }
 0x15a   :  { %1004 = vmatpush1.bf16.msra.mxu0 %v1003_v55  ;;  %v345_v3 = vpop.permute.xlu1 %344  ;;  %v199_v55 = vld [vmem:[#allocation12 + $0x10] sm:$0xff] }
 0x15b   :  { %v340_v4 = vpop.permute.xlu0 %339  ;;  %v372_v9 = vmul.f32 %v1636_v62, %v345_v3  ;;  %v373_v10 = vmul.f32 %v1641_v0, %v345_v3 }
 0x15c   :  { %v370_v14 = vmul.f32 %v1636_v62, %v340_v4  ;;  %v371_v15 = vmul.f32 %v1641_v0, %v340_v4 }
 0x15d   :  { %v388_v62 = vadd.f32 %v372_v9, %v305_v13  ;;  %v389_v29 = vadd.f32 %v373_v10, %v306_v20 }
 0x15e   :  { %v418_v16 = vpop.permute.xlu1 %417  ;;  %v386_v31 = vadd.f32 %v370_v14, %v303_v25  ;;  %v387_v32 = vadd.f32 %v371_v15, %v304_v26 }
 0x15f   :  { %v413_v18 = vpop.permute.xlu0 %412  ;;  %v1060_v19 = vpop.eup %1059  ;;  %v440_v21 = vadd.f32 %v418_v16, %v384_v8  ;;  %v441_v22 = vadd.f32 %v418_v16, %v385_v11 }
 0x160   :  { %v438_v23 = vadd.f32 %v413_v18, %v382_v12  ;;  %v1062_v24 = vpop.eup %1061  ;;  %v439_v27 = vadd.f32 %v413_v18, %v383_v17 }
 0x161   :  { %v1064_v28 = vpop.eup %1063  ;;  %1067 = vtanh.f32 %v440_v21 }
 0x162   :  { %v1066_v0 = vpop.eup %1065  ;;  %1069 = vtanh.f32 %v441_v22  ;;  %v428_v30 = vpop.permute.xlu1 %427  ;;  %v1007_v34 = vpack.c.bf16 %v1060_v19, %v1064_v28 }
 0x163   :  { %v423_v33 = vpop.permute.xlu0 %422  ;;  %1071 = vtanh.f32 %v438_v23  ;;  %v444_v35 = vadd.f32 %v428_v30, %v388_v62  ;;  %v445_v36 = vadd.f32 %v428_v30, %v389_v29  ;;  %v1005_v37 = vpack.c.bf16 %v1062_v24, %v1066_v0 }
 0x164   :  { %1073 = vtanh.f32 %v439_v27  ;;  %v442_v63 = vadd.f32 %v423_v33, %v386_v31  ;;  %v443_v39 = vadd.f32 %v423_v33, %v387_v32 }
 0x165   :  { %1075 = vtanh.f32 %v444_v35  ;;  %1006 = vmatprep.subr.bf16.mxu0 %v1005_v37 }
 0x166   :  { %1077 = vtanh.f32 %v445_v36  ;;  %1008 = vmatpush1.bf16.msra.mxu0 %v1007_v34  ;;  %v470_v7 = vpop.permute.xlu1 %469 }
 0x167   :  { %1079 = vtanh.f32 %v442_v63  ;;  %v465_v2 = vpop.permute.xlu0 %464 }
 0x168   :  { %1081 = vtanh.f32 %v443_v39 }
 0x16a   :  { %v480_v17 = vpop.permute.xlu1 %479 }
 0x16b   :  { %v1068_v1 = vpop.eup %1067  ;;  %v475_v12 = vpop.permute.xlu0 %474 }
 0x16c   :  { %v1070_v40 = vpop.eup %1069 }
 0x16d   :  { %v1072_v41 = vpop.eup %1071 }
 0x16e   :  { %v1074_v42 = vpop.eup %1073  ;;  %v1011_v43 = vpack.c.bf16 %v1068_v1, %v1072_v41  ;;  %v490_v31 = vpop.permute.xlu1 %489 }
 0x16f   :  { %v1076_v44 = vpop.eup %1075  ;;  %v1009_v45 = vpack.c.bf16 %v1070_v40, %v1074_v42  ;;  %v485_v24 = vpop.permute.xlu0 %484 }
 0x170   :  { %v1078_v46 = vpop.eup %1077 }
 0x171   :  { %v1080_v47 = vpop.eup %1079  ;;  %1010 = vmatprep.subr.bf16.mxu0 %v1009_v45 }
 0x172   :  { %v1082_v48 = vpop.eup %1081  ;;  %1012 = vmatpush1.bf16.msra.mxu0 %v1011_v43  ;;  %v1015_v49 = vpack.c.bf16 %v1076_v44, %v1080_v47 }
 0x173   :  { %v1013_v50 = vpack.c.bf16 %v1078_v46, %v1082_v48  ;;  %v495_v63 = vpop.permute.xlu0 %494  ;;  %v500_v46 = vpop.permute.xlu1 %499 }
 0x175   :  { %1014 = vmatprep.subr.bf16.mxu0 %v1013_v50 }
 0x176   :  { %1016 = vmatpush1.bf16.msra.mxu0 %v1015_v49 }
 0x179   :  { %985 = vmatmul.mubr.msk.f32.vlgmr.msra.gmra.mrb[0].mxu0 %vm502_vm0, %v197_v51 }
 0x17a   :  { %597 = vmatprep.mubr.f32.mxu0 %v1416_v38 }
 0x17d   :  { %986 = vmatmul.mubr.msk.f32.gmra.mrb[2].mxu0 %vm502_vm0, %v198_v54 }
 0x17e   :  { %603 = vmatprep.mubr.f32.mxu0 %v1416_v38 }
 0x181   :  { %987 = vmatmul.mubr.msk.f32.gmra.mrb[4].mxu0 %vm502_vm0, %v199_v55 }
 0x182   :  { %609 = vmatprep.mubr.f32.mxu0 %v1416_v38 }
 0x185   :  { %988 = vmatmul.mubr.msk.f32.gmra.mrb[6].mxu0 %vm502_vm0, %v200_v57 }
 0x186   :  { %615 = vmatprep.mubr.f32.mxu0 %v1416_v38 }
 0x189   :  { %989 = vmatmul.mubr.msk.f32.gmra.mrb[8].mxu0 %vm502_vm0, %v201_v58 }
 0x18a   :  { %621 = vmatprep.mubr.f32.mxu0 %v1416_v38 }
 0x18d   :  { %990 = vmatmul.mubr.msk.f32.gmra.mrb[10].mxu0 %vm502_vm0, %v202_v59 }
 0x18e   :  { %627 = vmatprep.mubr.f32.mxu0 %v1416_v38 }
 0x191   :  { %991 = vmatmul.mubr.msk.f32.gmra.mrb[12].mxu0 %vm502_vm0, %v203_v60 }
 0x192   :  { %633 = vmatprep.mubr.f32.mxu0 %v1416_v38 }
 0x195   :  { %992 = vmatmul.mubr.msk.f32.gmra.mrb[14].mxu0 %vm502_vm0, %v204_v61 }
 0x24c   :  { %v593_v3 = vpop.f32.mrb[0].mxu0 }
 0x24d   :  { %v594_v4 = vadd.f32 %v593_v3, %v465_v2  ;;  %v595_v5 = vpop.f32.mrb[1].mxu0 }
 0x24e   :  { %v596_v6 = vadd.f32 %v595_v5, %v465_v2 }
 0x24f   :  { %1083 = vtanh.f32 %v594_v4 }
 0x250   :  { %v599_v8 = vpop.f32.mrb[2].mxu0  ;;  %1085 = vtanh.f32 %v596_v6  ;;  %v213_v6 = vld [vmem:[#allocation15] sm:$0xff] }
 0x251   :  { %v600_v9 = vadd.f32 %v599_v8, %v470_v7  ;;  %v601_v10 = vpop.f32.mrb[3].mxu0  ;;  %v215_v8 = vld [vmem:[#allocation15 + $0x10] sm:$0xff] }
 0x252   :  { %v602_v11 = vadd.f32 %v601_v10, %v470_v7  ;;  %v214_v7 = vld [vmem:[#allocation15 + $0x8] sm:$0xff]  ;;  %v217_v10 = vld [vmem:[#allocation15 + $0x20] sm:$0xff] }
 0x253   :  { %1087 = vtanh.f32 %v600_v9  ;;  %v216_v9 = vld [vmem:[#allocation15 + $0x18] sm:$0xff] }
 0x254   :  { %1089 = vtanh.f32 %v602_v11  ;;  %v605_v13 = vpop.f32.mrb[4].mxu0  ;;  %v218_v11 = vld [vmem:[#allocation15 + $0x28] sm:$0xff] }
 0x255   :  { %v606_v14 = vadd.f32 %v605_v13, %v475_v12  ;;  %v607_v15 = vpop.f32.mrb[5].mxu0  ;;  %v220_v13 = vld [vmem:[#allocation15 + $0x38] sm:$0xff] }
 0x256   :  { %v608_v16 = vadd.f32 %v607_v15, %v475_v12  ;;  %v219_v12 = vld [vmem:[#allocation15 + $0x30] sm:$0xff]  ;;  %v664_v15 = vpop.permute.xlu1 %663 }
 0x257   :  { %1091 = vtanh.f32 %v606_v14  ;;  %v659_v14 = vpop.permute.xlu0 %658 }
 0x258   :  { %v611_v18 = vpop.f32.mrb[6].mxu0  ;;  %1093 = vtanh.f32 %v608_v16 }
 0x259   :  { %v612_v19 = vadd.f32 %v611_v18, %v480_v17  ;;  %v613_v20 = vpop.f32.mrb[7].mxu0  ;;  %v1084_v22 = vpop.eup %1083 }
 0x25a   :  { %v614_v21 = vadd.f32 %v613_v20, %v480_v17  ;;  %v1086_v23 = vpop.eup %1085  ;;  %v674_v17 = vpop.permute.xlu1 %673 }
 0x25b   :  { %1095 = vtanh.f32 %v612_v19  ;;  %v669_v16 = vpop.permute.xlu0 %668 }
 0x25c   :  { %1097 = vtanh.f32 %v614_v21  ;;  %v617_v25 = vpop.f32.mrb[8].mxu0 }
 0x25d   :  { %v1088_v26 = vpop.eup %1087  ;;  %v618_v27 = vadd.f32 %v617_v25, %v485_v24  ;;  %v619_v28 = vpop.f32.mrb[9].mxu0 }
 0x25e   :  { %v1090_v62 = vpop.eup %1089  ;;  %v620_v29 = vadd.f32 %v619_v28, %v485_v24  ;;  %v1019_v0 = vpack.c.bf16 %v1088_v26, %v1084_v22  ;;  %v684_v24 = vpop.permute.xlu1 %683 }
 0x25f   :  { %v1017_v30 = vpack.c.bf16 %v1090_v62, %v1086_v23  ;;  %1099 = vtanh.f32 %v618_v27  ;;  %v679_v22 = vpop.permute.xlu0 %678 }
 0x260   :  { %v623_v32 = vpop.f32.mrb[10].mxu0  ;;  %1101 = vtanh.f32 %v620_v29 }
 0x261   :  { %v624_v33 = vadd.f32 %v623_v32, %v490_v31  ;;  %v625_v34 = vpop.f32.mrb[11].mxu0  ;;  %1018 = vmatprep.subr.bf16.mxu1 %v1017_v30  ;;  %v1092_v36 = vpop.eup %1091 }
 0x262   :  { %v626_v35 = vadd.f32 %v625_v34, %v490_v31  ;;  %1020 = vmatpush1.bf16.msra.mxu1 %v1019_v0  ;;  %v1094_v37 = vpop.eup %1093  ;;  %v694_v30 = vpop.permute.xlu1 %693 }
 0x263   :  { %1103 = vtanh.f32 %v624_v33  ;;  %v689_v28 = vpop.permute.xlu0 %688 }
 0x264   :  { %1105 = vtanh.f32 %v626_v35  ;;  %v629_v39 = vpop.f32.mrb[12].mxu0 }
 0x265   :  { %v1096_v1 = vpop.eup %1095  ;;  %v630_v40 = vadd.f32 %v629_v39, %v495_v63  ;;  %v631_v41 = vpop.f32.mrb[13].mxu0 }
 0x266   :  { %v1098_v42 = vpop.eup %1097  ;;  %v632_v43 = vadd.f32 %v631_v41, %v495_v63  ;;  %v1023_v44 = vpack.c.bf16 %v1096_v1, %v1092_v36  ;;  %v857_v1 = vpop.permute.xlu1 %856 }
 0x267   :  { %v1021_v45 = vpack.c.bf16 %v1098_v42, %v1094_v37  ;;  %1107 = vtanh.f32 %v630_v40  ;;  %v852_v36 = vpop.permute.xlu0 %851 }
 0x268   :  { %v635_v47 = vpop.f32.mrb[14].mxu0  ;;  %1109 = vtanh.f32 %v632_v43 }
 0x269   :  { %v636_v48 = vadd.f32 %v635_v47, %v500_v46  ;;  %v637_v49 = vpop.f32.mrb[15].mxu0  ;;  %1022 = vmatprep.subr.bf16.mxu1 %v1021_v45  ;;  %v1100_v51 = vpop.eup %1099 }
 0x26a   :  { %v638_v50 = vadd.f32 %v637_v49, %v500_v46  ;;  %1024 = vmatpush1.bf16.msra.mxu1 %v1023_v44  ;;  %v1102_v54 = vpop.eup %1101 }
 0x26b   :  { %1111 = vtanh.f32 %v636_v48 }
 0x26c   :  { %1113 = vtanh.f32 %v638_v50 }
 0x26d   :  { %v1104_v55 = vpop.eup %1103 }
 0x26e   :  { %v1106_v57 = vpop.eup %1105  ;;  %v1027_v58 = vpack.c.bf16 %v1104_v55, %v1100_v51  ;;  %v862_v51 = vpop.permute.xlu0 %861 }
 0x26f   :  { %v1025_v59 = vpack.c.bf16 %v1106_v57, %v1102_v54 }
 0x271   :  { %1026 = vmatprep.subr.bf16.mxu1 %v1025_v59  ;;  %v1108_v60 = vpop.eup %1107 }
 0x272   :  { %1028 = vmatpush1.bf16.msra.mxu1 %v1027_v58  ;;  %v1110_v61 = vpop.eup %1109 }
 0x275   :  { %v1112_v2 = vpop.eup %1111 }
 0x276   :  { %v1114_v3 = vpop.eup %1113  ;;  %v1031_v4 = vpack.c.bf16 %v1112_v2, %v1108_v60 }
 0x277   :  { %v1029_v5 = vpack.c.bf16 %v1114_v3, %v1110_v61 }
 0x279   :  { %1030 = vmatprep.subr.bf16.mxu1 %v1029_v5  ;;  %v867_v5 = vpop.permute.xlu1 %866 }
 0x27a   :  { %1032 = vmatpush1.bf16.msra.mxu1 %v1031_v4 }
 0x27d   :  { %993 = vmatmul.mubr.msk.f32.vlgmr.msra.gmra.mrb[0].mxu1 %vm502_vm0, %v213_v6 }
 0x27e   :  { %790 = vmatprep.mubr.f32.mxu1 %v1416_v38 }
 0x281   :  { %994 = vmatmul.mubr.msk.f32.gmra.mrb[2].mxu1 %vm502_vm0, %v214_v7 }
 0x282   :  { %796 = vmatprep.mubr.f32.mxu1 %v1416_v38 }
 0x285   :  { %995 = vmatmul.mubr.msk.f32.gmra.mrb[4].mxu1 %vm502_vm0, %v215_v8 }
 0x286   :  { %802 = vmatprep.mubr.f32.mxu1 %v1416_v38 }
 0x289   :  { %996 = vmatmul.mubr.msk.f32.gmra.mrb[6].mxu1 %vm502_vm0, %v216_v9 }
 0x28a   :  { %808 = vmatprep.mubr.f32.mxu1 %v1416_v38 }
 0x28d   :  { %997 = vmatmul.mubr.msk.f32.gmra.mrb[8].mxu1 %vm502_vm0, %v217_v10 }
 0x28e   :  { %814 = vmatprep.mubr.f32.mxu1 %v1416_v38 }
 0x291   :  { %998 = vmatmul.mubr.msk.f32.gmra.mrb[10].mxu1 %vm502_vm0, %v218_v11 }
 0x292   :  { %820 = vmatprep.mubr.f32.mxu1 %v1416_v38 }
 0x295   :  { %999 = vmatmul.mubr.msk.f32.gmra.mrb[12].mxu1 %vm502_vm0, %v219_v12 }
 0x296   :  { %826 = vmatprep.mubr.f32.mxu1 %v1416_v38 }
 0x299   :  { %1000 = vmatmul.mubr.msk.f32.gmra.mrb[14].mxu1 %vm502_vm0, %v220_v13 }
 0x350   :  { %v786_v18 = vpop.f32.mrb[0].mxu1 }
 0x351   :  { %v787_v19 = vadd.f32 %v786_v18, %v659_v14  ;;  %v788_v20 = vpop.f32.mrb[1].mxu1 }
 0x352   :  { %v789_v21 = vadd.f32 %v788_v20, %v659_v14 }
 0x353   :  { %1115 = vtanh.f32 %v787_v19 }
 0x354   :  { %v792_v23 = vpop.f32.mrb[2].mxu1  ;;  %1117 = vtanh.f32 %v789_v21 }
 0x355   :  { %v793_v25 = vadd.f32 %v792_v23, %v664_v15  ;;  %v794_v26 = vpop.f32.mrb[3].mxu1 }
 0x356   :  { %v795_v27 = vadd.f32 %v794_v26, %v664_v15  ;;  %v877_v26 = vpop.permute.xlu1 %876 }
 0x357   :  { %1119 = vtanh.f32 %v793_v25 }
 0x358   :  { %1121 = vtanh.f32 %v795_v27  ;;  %v798_v38 = vpop.f32.mrb[4].mxu1 }
 0x359   :  { %v799_v62 = vadd.f32 %v798_v38, %v669_v16  ;;  %v800_v29 = vpop.f32.mrb[5].mxu1 }
 0x35a   :  { %v801_v0 = vadd.f32 %v800_v29, %v669_v16  ;;  %v872_v16 = vpop.permute.xlu0 %871 }
 0x35b   :  { %1123 = vtanh.f32 %v799_v62 }
 0x35c   :  { %1125 = vtanh.f32 %v801_v0  ;;  %v804_v31 = vpop.f32.mrb[6].mxu1 }
 0x35d   :  { %v805_v32 = vadd.f32 %v804_v31, %v674_v17  ;;  %v806_v33 = vpop.f32.mrb[7].mxu1  ;;  %v1116_v35 = vpop.eup %1115 }
 0x35e   :  { %v807_v34 = vadd.f32 %v806_v33, %v674_v17  ;;  %v1118_v37 = vpop.eup %1117  ;;  %v889_v43 = vmul.f32 %v1116_v35, %v852_v36  ;;  %v882_v31 = vpop.permute.xlu0 %881 }
 0x35f   :  { %1127 = vtanh.f32 %v805_v32  ;;  %v890_v46 = vmul.f32 %v1118_v37, %v852_v36 }
 0x360   :  { %1129 = vtanh.f32 %v807_v34  ;;  %v810_v63 = vpop.f32.mrb[8].mxu1 }
 0x361   :  { %v1120_v39 = vpop.eup %1119  ;;  %v811_v40 = vadd.f32 %v810_v63, %v679_v22  ;;  %v812_v41 = vpop.f32.mrb[9].mxu1 }
 0x362   :  { %v1122_v42 = vpop.eup %1121  ;;  %v891_v44 = vmul.f32 %v1120_v39, %v857_v1  ;;  %v813_v45 = vadd.f32 %v812_v41, %v679_v22 }
 0x363   :  { %v892_v47 = vmul.f32 %v1122_v42, %v857_v1  ;;  %1131 = vtanh.f32 %v811_v40 }
 0x364   :  { %v905_v48 = vadd.f32 %v891_v44, %v889_v43  ;;  %1133 = vtanh.f32 %v813_v45  ;;  %v816_v49 = vpop.f32.mrb[10].mxu1 }
 0x365   :  { %v1124_v50 = vpop.eup %1123  ;;  %v918_v54 = vadd.f32 %v892_v47, %v890_v46  ;;  %v817_v55 = vadd.f32 %v816_v49, %v684_v24  ;;  %v818_v57 = vpop.f32.mrb[11].mxu1  ;;  %v1417_v49 = vmov 1966171168  }
 0x366   :  { %v1126_v58 = vpop.eup %1125  ;;  %v893_v59 = vmul.f32 %v1124_v50, %v862_v51  ;;  %v819_v60 = vadd.f32 %v818_v57, %v684_v24  ;;  %v946_v50 = vunpack.c.l.s4 %v1417_v49 }
 0x367   :  { %v894_v61 = vmul.f32 %v1126_v58, %v862_v51  ;;  %1135 = vtanh.f32 %v817_v55 }
 0x368   :  { %v906_v2 = vadd.f32 %v905_v48, %v893_v59  ;;  %1137 = vtanh.f32 %v819_v60  ;;  %v822_v3 = vpop.f32.mrb[12].mxu1  ;;  %v947_v59 = vunpack.c.0.s8 %v946_v50 }
 0x369   :  { %v1128_v4 = vpop.eup %1127  ;;  %v919_v6 = vadd.f32 %v918_v54, %v894_v61  ;;  %v823_v7 = vadd.f32 %v822_v3, %v689_v28  ;;  %v824_v8 = vpop.f32.mrb[13].mxu1 }
 0x36a   :  { %v1130_v9 = vpop.eup %1129  ;;  %v895_v10 = vmul.f32 %v1128_v4, %v867_v5  ;;  %v825_v11 = vadd.f32 %v824_v8, %v689_v28  ;;  %v934_v54 = vpop.permute.xlu0 %933 }
 0x36b   :  { %v896_v12 = vmul.f32 %v1130_v9, %v867_v5  ;;  %1139 = vtanh.f32 %v823_v7  ;;  %v939_v60 = vrot.slane %v934_v54, %v1632_v56  ;;  %v950_v5 = vsub.s32 %v947_v59, %v1629_v53 }
 0x36c   :  { %v907_v13 = vadd.f32 %v906_v2, %v895_v10  ;;  %1141 = vtanh.f32 %v825_v11  ;;  %v828_v14 = vpop.f32.mrb[14].mxu1 }
 0x36d   :  { %v1132_v15 = vpop.eup %1131  ;;  %v920_v17 = vadd.f32 %v919_v6, %v896_v12  ;;  %v829_v18 = vadd.f32 %v828_v14, %v694_v30  ;;  %v830_v19 = vpop.f32.mrb[15].mxu1 }
 0x36e   :  { %v1134_v20 = vpop.eup %1133  ;;  %v897_v21 = vmul.f32 %v1132_v15, %v872_v16  ;;  %v831_v22 = vadd.f32 %v830_v19, %v694_v30  ;;  %v887_v30 = vpop.permute.xlu1 %886 }
 0x36f   :  { %v898_v23 = vmul.f32 %v1134_v20, %v872_v16  ;;  %1143 = vtanh.f32 %v829_v18 }
 0x370   :  { %v908_v24 = vadd.f32 %v907_v13, %v897_v21  ;;  %1145 = vtanh.f32 %v831_v22 }
 0x371   :  { %v1136_v25 = vpop.eup %1135  ;;  %v921_v27 = vadd.f32 %v920_v17, %v898_v23 }
 0x372   :  { %v1138_v38 = vpop.eup %1137  ;;  %v899_v28 = vmul.f32 %v1136_v25, %v877_v26 }
 0x373   :  { %v900_v62 = vmul.f32 %v1138_v38, %v877_v26 }
 0x374   :  { %v909_v29 = vadd.f32 %v908_v24, %v899_v28 }
 0x375   :  { %v1140_v0 = vpop.eup %1139  ;;  %v922_v32 = vadd.f32 %v921_v27, %v900_v62 }
 0x376   :  { %v1142_v33 = vpop.eup %1141  ;;  %v901_v34 = vmul.f32 %v1140_v0, %v882_v31 }
 0x377   :  { %v902_v35 = vmul.f32 %v1142_v33, %v882_v31 }
 0x378   :  { %v910_v36 = vadd.f32 %v909_v29, %v901_v34 }
 0x379   :  { %v1144_v37 = vpop.eup %1143  ;;  %v923_v63 = vadd.f32 %v922_v32, %v902_v35 }
 0x37a   :  { %v1146_v39 = vpop.eup %1145  ;;  %v903_v1 = vmul.f32 %v1144_v37, %v887_v30 }
 0x37b   :  { %v904_v40 = vmul.f32 %v1146_v39, %v887_v30 }
 0x37c   :  { %v911_v41 = vadd.f32 %v910_v36, %v903_v1 }
 0x37d   :  { %v924_v42 = vadd.f32 %v923_v63, %v904_v40 }
 0x37e   :  { %v912_v43 = vrot.slane %v911_v41, 4 }
 0x37f   :  { %v925_v44 = vrot.slane %v924_v42, 4 }
 0x380   :  { %v913_v45 = vadd.f32 %v912_v43, %v911_v41 }
 0x381   :  { %v926_v46 = vadd.f32 %v925_v44, %v924_v42 }
 0x382   :  { %v914_v47 = vrot.slane %v913_v45, 2 }
 0x383   :  { %v927_v48 = vrot.slane %v926_v46, 2 }
 0x384   :  { %v915_v51 = vadd.f32 %v914_v47, %v913_v45 }
 0x385   :  { %v928_v55 = vadd.f32 %v927_v48, %v926_v46 }
 0x386   :  { %v916_v57 = vrot.slane %v915_v51, 1 }
 0x387   :  { %v929_v58 = vrot.slane %v928_v55, 1 }
 0x388   :  { %v917_v61 = vadd.f32 %v916_v57, %v915_v51 }
 0x389   :  { %v930_v2 = vadd.f32 %v929_v58, %v928_v55 }
 0x38a   :  { %v940_v3 = vadd.f32 %v939_v60, %v917_v61 }
 0x38b   :  { %v941_v4 = vadd.f32 %v939_v60, %v930_v2 }
 0x38d   :  { %v944_v6 = vcombine.low %v940_v3, %v941_v4 }
 0x38f   :  { %v951_v7 = vrot.slane %v944_v6, %v950_v5 }
 0x391   :  { %v958_v8 = vrot.slane %v951_v7, %v950_v5 }
 0x393   :  { %964 = vst.msk [vmem:[#allocation20] sm:$0x3] %vm962_vm1, %v958_v8 }
 0x394   :  { %1378 = shalt.err (!%p1375_p0)
}
 0x395   :  { %s1379_s4 = scalar_lea.hbm %s1733_s11, 32 }
 0x396   :  { %p1380_p1 = scmp.ne.s32.totalorder %s1733_s11, %s1379_s4  ;;  %p1383_p2 = scmp.lt.u32.totalorder %s1379_s4, %s1733_s11 }
 0x398   :  { %p1385_p3 = pnand %p1383_p2, %p1380_p1 }
 0x39a   :  { %1388 = shalt.err (!%p1385_p3)
}
 0x39b   :  { %974 = dma.vmem_to_hbm [thread:$0]  %s972_s20, 32, %s1733_s11, [#allocation5]  }
 0x39c   :  { %1401 = dma.done.wait [#allocation5], 32  }
 0x39d   :  { %1402 = vsyncadd [#allocation5], 4294967264 }
 0x39e   :  { %978 = vsyncpa [#allocation4], 1 }
 0x39f   :  { %979 = vsyncpa [#allocation7], 1 }
 0x3a0   :  { %980 = vsyncpa [#allocation10], 1 }
 0x3a1   :  { %981 = vsyncpa [#allocation13], 1 }
 0x3a2   :  { %982 = vsyncpa [#allocation16], 1 }
 0x3a3   :  { %983 = vsyncpa [#allocation19], 1 }
 0x3a4   :  { %984 = vsyncpa [#allocation5], 1 }

</bundles_post_ra>
